<compile_context>
chip_gen: v7x
topology: tpu7x:2x2x1
jax: 0.10.0
libtpu: 0.0.40
codegen_flags: <defaults>
</compile_context>

<pallas_src>
import jax
import jax.numpy as jnp
import numpy as np
from jax.experimental import pallas as pl
from jax.experimental.pallas import tpu as pltpu

LANE = 128
SUBLANE = 8


def _round_up(x, m):
    return (x + m - 1) // m * m


def mlp_kernel(xi_ref, xc_ref, w1i_ref, w1c_ref, b1_ref, w2_ref, b2_ref,
               w3_ref, b3_ref, o_ref):
    """One batch tile: relu(xi@W1i + xc@W1c + b1) -> relu(.@W2 + b2) -> .@W3 + b3.

    W1i / W1c already contain the folded nodule / code embeddings, so the whole
    forward pass is four MXU matmuls; bias add / ReLU / accumulation stay f32.
    """
    h = (jnp.dot(xi_ref[...], w1i_ref[...], preferred_element_type=jnp.float32)
         + jnp.dot(xc_ref[...], w1c_ref[...], preferred_element_type=jnp.float32)
         + b1_ref[...])
    h = jnp.maximum(h, 0.0)
    h = jnp.dot(h.astype(w2_ref.dtype), w2_ref[...],
                preferred_element_type=jnp.float32) + b2_ref[...]
    h = jnp.maximum(h, 0.0)
    o = jnp.dot(h.astype(w3_ref.dtype), w3_ref[...],
                preferred_element_type=jnp.float32) + b3_ref[...]
    o_ref[...] = o.astype(o_ref.dtype)


def prepare_mlp_params(params, n_img, n_code, nod_dim, code_dim, feat_dim,
                       compute_dtype=jnp.float32):
    """Fold embeddings into layer 1 and lane-pad weights ONCE (host-side numpy).

    Returns a dict of device arrays reused by every mlp_forward call.
    """
    p = [np.asarray(a, np.float32) for a in params]
    (w_img, b_img, w_code, b_code, w1, b1, w2, b2, w3, b3) = p
    dim = w1.shape[0]
    num_classes = w3.shape[1]
    img_flat = n_img * nod_dim
    code_flat = n_code * code_dim

    # Block-diagonal embedding matrix, split into its img / code halves.
    w_emb_img = np.zeros((img_flat, dim), np.float32)
    w_emb_code = np.zeros((code_flat, dim), np.float32)
    b_emb = np.zeros((dim,), np.float32)
    for n in range(n_img):
        w_emb_img[n * nod_dim:(n + 1) * nod_dim,
                  n * feat_dim:(n + 1) * feat_dim] = w_img
        b_emb[n * feat_dim:(n + 1) * feat_dim] = b_img.reshape(-1)
    for n in range(n_code):
        c0 = (n_img + n) * feat_dim
        w_emb_code[n * code_dim:(n + 1) * code_dim, c0:c0 + feat_dim] = w_code
        b_emb[c0:c0 + feat_dim] = b_code.reshape(-1)

    # Fold the embedding into layer 1:  emb(x) @ W1 == xi @ W1i + xc @ W1c.
    w1_img = w_emb_img @ w1                    # (img_flat, dim)
    w1_code = w_emb_code @ w1                  # (code_flat, dim)
    b1f = b_emb @ w1 + b1.reshape(-1)          # (dim,)

    dim_pad = _round_up(dim, LANE)
    cls_pad = _round_up(num_classes, LANE)

    def pad_w(w, rows, cols):
        out = np.zeros((rows, cols), np.float32)
        out[:w.shape[0], :w.shape[1]] = w
        return out

    def pad_b(v, cols):
        out = np.zeros((1, cols), np.float32)
        out[0, :v.size] = np.asarray(v).reshape(-1)
        return out

    return dict(
        w1_img=jnp.asarray(pad_w(w1_img, img_flat, dim_pad), compute_dtype),
        w1_code=jnp.asarray(pad_w(w1_code, code_flat, dim_pad), compute_dtype),
        w2=jnp.asarray(pad_w(w2, dim_pad, dim_pad), compute_dtype),
        w3=jnp.asarray(pad_w(w3, dim_pad, cls_pad), compute_dtype),
        # Biases stay f32 (added to the f32 accumulator inside the kernel).
        b1=jnp.asarray(pad_b(b1f, dim_pad)),
        b2=jnp.asarray(pad_b(b2, dim_pad)),
        b3=jnp.asarray(pad_b(b3, cls_pad)),
        num_classes=num_classes,
        dim_pad=dim_pad,
        cls_pad=cls_pad,
        compute_dtype=jnp.dtype(compute_dtype),
    )


def _choose_tile(b_aligned, tile_b, row_align):
    # >= 2 grid tiles when there is enough work so both v7x TensorCores get fed.
    half = _round_up(-(-b_aligned // 2), row_align)
    tile = _round_up(max(row_align, min(tile_b, half)), row_align)
    # Cap for v5e's 16 MiB default scoped-VMEM (double-buffered in/out tiles).
    return min(tile, 4096)


def mlp_forward(img, code, prepared, *, tile_b=2048, out_dtype=None,
                vmem_limit_bytes=None):
    """img: (b, n_img, nod_dim), code: (b, n_code, code_dim) -> (b, num_classes)."""
    compute_dtype = prepared["compute_dtype"]
    out_dtype = compute_dtype if out_dtype is None else out_dtype
    dim_pad, cls_pad = prepared["dim_pad"], prepared["cls_pad"]
    num_classes = prepared["num_classes"]

    b = img.shape[0]
    xi = img.reshape(b, -1).astype(compute_dtype)    # (b, n_img * nod_dim)
    xc = code.reshape(b, -1).astype(compute_dtype)   # (b, n_code * code_dim)
    img_flat, code_flat = xi.shape[1], xc.shape[1]

    # Sublane-aligned rows (8 for f32, 16 for bf16); pad batch ONLY to this
    # boundary, not to a full tile — the partial last grid tile is masked.
    packing = max(1, 4 // jnp.dtype(compute_dtype).itemsize)
    row_align = SUBLANE * packing
    b_aligned = _round_up(max(b, 1), row_align)
    if b_aligned != b:
        xi = jnp.pad(xi, ((0, b_aligned - b), (0, 0)))
        xc = jnp.pad(xc, ((0, b_aligned - b), (0, 0)))

    tile = _choose_tile(b_aligned, tile_b, row_align)
    grid = (pl.cdiv(b_aligned, tile),)

    def resident(shape):
        # Constant block index -> buffer stays resident in VMEM across the grid.
        return pl.BlockSpec(shape, lambda i: (0, 0))

    out = pl.pallas_call(
        mlp_kernel,
        out_shape=jax.ShapeDtypeStruct((b_aligned, cls_pad), out_dtype),
        grid_spec=pltpu.PrefetchScalarGridSpec(
            num_scalar_prefetch=0,
            grid=grid,
            in_specs=[
                # Activation streams: last dims equal the full (unpadded)
                # array dims, so no 128-lane K padding / host-side concat.
                pl.BlockSpec((tile, img_flat), lambda i: (i, 0)),
                pl.BlockSpec((tile, code_flat), lambda i: (i, 0)),
                resident((img_flat, dim_pad)),   # W1 (img half, embedding folded)
                resident((code_flat, dim_pad)),  # W1 (code half, embedding folded)
                resident((1, dim_pad)),          # b1 (folded)
                resident((dim_pad, dim_pad)),    # W2
                resident((1, dim_pad)),          # b2
                resident((dim_pad, cls_pad)),    # W3
                resident((1, cls_pad)),          # b3
            ],
            out_specs=pl.BlockSpec((tile, cls_pad), lambda i: (i, 0)),
        ),
        compiler_params=pltpu.CompilerParams(
            dimension_semantics=("parallel",),   # shard batch tiles over v7x's 2 TCs
            vmem_limit_bytes=vmem_limit_bytes),
    )(xi, xc, prepared["w1_img"], prepared["w1_code"], prepared["b1"],
      prepared["w2"], prepared["b2"], prepared["w3"], prepared["b3"])

    return out[:b, :num_classes]


def init_linear(key, in_dim, out_dim):
    """PyTorch-style uniform(-1/sqrt(in), 1/sqrt(in)) init; W stored (in, out)."""
    kw, kb = jax.random.split(key)
    bound = 1.0 / np.sqrt(in_dim)
    w = jax.random.uniform(kw, (in_dim, out_dim), jnp.float32, -bound, bound)
    b = jax.random.uniform(kb, (1, out_dim), jnp.float32, -bound, bound)
    return w, b


def reference_forward(img, code, params):
    (w_img, b_img, w_code, b_code, w1, b1, w2, b2, w3, b3) = params
    b = img.shape[0]
    x_img = jnp.einsum('bnd,df->bnf', img, w_img) + b_img[0]
    x_code = jnp.einsum('bnd,df->bnf', code, w_code) + b_code[0]
    x = jnp.concatenate([x_img.reshape(b, -1), x_code.reshape(b, -1)], axis=1)
    h = jax.nn.relu(x @ w1 + b1)
    h = jax.nn.relu(h @ w2 + b2)
    return h @ w3 + b3


if __name__ == "__main__":
    # Small, consistent shapes:
    #   num_feat = 4, feat_dim = 8  -> dim = 32
    #   n_img = 3 image nodules, n_code = 1 code entry (3 + 1 == num_feat)
    batch = 2
    num_feat, feat_dim = 4, 8
    nod_dim, code_dim = 6, 10
    num_classes = 3
    n_img, n_code = num_feat - 1, 1
    dim = num_feat * feat_dim

    key = jax.random.PRNGKey(0)
    k_img, k_code, k_w0, k_w1, k_w2, k_w3, k_w4 = jax.random.split(key, 7)

    img = jax.random.normal(k_img, (batch, n_img, nod_dim), jnp.float32)
    code = jax.random.normal(k_code, (batch, n_code, code_dim), jnp.float32)

    w_img, b_img = init_linear(k_w0, nod_dim, feat_dim)     # MultiNoduleEmbedding (modeled)
    w_code, b_code = init_linear(k_w1, code_dim, feat_dim)  # code_embedding
    w1, b1 = init_linear(k_w2, dim, dim)                    # mlp[0]
    w2, b2 = init_linear(k_w3, dim, dim)                    # mlp[2]
    w3, b3 = init_linear(k_w4, dim, num_classes)            # mlp[4]
    params = (w_img, b_img, w_code, b_code, w1, b1, w2, b2, w3, b3)

    ref = reference_forward(img, code, params)

    # f32 path: tight numeric check (embedding fold changes summation order -> 1e-4).
    prep_f32 = prepare_mlp_params(params, n_img, n_code, nod_dim, code_dim,
                                  feat_dim, compute_dtype=jnp.float32)
    fwd_f32 = jax.jit(lambda i, c: mlp_forward(i, c, prep_f32))
    out_f32 = jax.block_until_ready(fwd_f32(img, code))
    np.testing.assert_allclose(np.asarray(out_f32), np.asarray(ref),
                               rtol=1e-4, atol=1e-4)

    # bf16 production path (halves HBM activation + output streams); loose check.
    prep_bf16 = prepare_mlp_params(params, n_img, n_code, nod_dim, code_dim,
                                   feat_dim, compute_dtype=jnp.bfloat16)
    fwd_bf16 = jax.jit(lambda i, c: mlp_forward(i, c, prep_bf16))
    out_bf16 = jax.block_until_ready(fwd_bf16(img, code))
    max_err = float(np.max(np.abs(np.asarray(out_bf16.astype(jnp.float32))
                                  - np.asarray(ref, np.float32))))
    assert max_err < 0.1, f"bf16 path max abs error too large: {max_err}"

    print("KERNEL_OK")
</pallas_src>

<mosaic_0001>
module attributes {stable_mosaic.version = 11 : i64} {
  func.func @mlp_kernel(%arg0: i32, %arg1: memref<8x18xf32, #tpu.memory_space<vmem>>, %arg2: memref<8x10xf32, #tpu.memory_space<vmem>>, %arg3: memref<18x128xf32, #tpu.memory_space<vmem>>, %arg4: memref<10x128xf32, #tpu.memory_space<vmem>>, %arg5: memref<1x128xf32, #tpu.memory_space<vmem>>, %arg6: memref<128x128xf32, #tpu.memory_space<vmem>>, %arg7: memref<1x128xf32, #tpu.memory_space<vmem>>, %arg8: memref<128x128xf32, #tpu.memory_space<vmem>>, %arg9: memref<1x128xf32, #tpu.memory_space<vmem>>, %arg10: memref<8x128xf32, #tpu.memory_space<vmem>>) attributes {dimension_semantics = [#tpu.dimension_semantics<parallel>], iteration_bounds = array<i64: 1>, scalar_prefetch = 0 : i64, scratch_operands = 0 : i64, tpu.core_type = #tpu.core_type<tc>, window_params = [{transform_indices = @transform_0, window_bounds = array<i64: 8, 18>}, {transform_indices = @transform_1, window_bounds = array<i64: 8, 10>}, {pipeline_mode = #tpu.pipeline_mode<synchronous>, transform_indices = @transform_2, window_bounds = array<i64: 18, 128>}, {pipeline_mode = #tpu.pipeline_mode<synchronous>, transform_indices = @transform_3, window_bounds = array<i64: 10, 128>}, {pipeline_mode = #tpu.pipeline_mode<synchronous>, transform_indices = @transform_4, window_bounds = array<i64: 1, 128>}, {pipeline_mode = #tpu.pipeline_mode<synchronous>, transform_indices = @transform_5, window_bounds = array<i64: 128, 128>}, {pipeline_mode = #tpu.pipeline_mode<synchronous>, transform_indices = @transform_6, window_bounds = array<i64: 1, 128>}, {pipeline_mode = #tpu.pipeline_mode<synchronous>, transform_indices = @transform_7, window_bounds = array<i64: 128, 128>}, {pipeline_mode = #tpu.pipeline_mode<synchronous>, transform_indices = @transform_8, window_bounds = array<i64: 1, 128>}, {transform_indices = @transform_9, window_bounds = array<i64: 8, 128>}]} {
    %c0 = arith.constant 0 : index
    %c0_0 = arith.constant 0 : index
    %0 = vector.load %arg1[%c0, %c0_0] : memref<8x18xf32, #tpu.memory_space<vmem>>, vector<8x18xf32>
    %c0_1 = arith.constant 0 : index
    %c0_2 = arith.constant 0 : index
    %1 = vector.load %arg3[%c0_1, %c0_2] : memref<18x128xf32, #tpu.memory_space<vmem>>, vector<18x128xf32>
    %cst = arith.constant dense<0.000000e+00> : vector<8x128xf32>
    %2 = tpu.matmul %0, %1, %cst {dimension_numbers = #tpu.dot_dimension_numbers<[1], [0], [0], [1], [0, 0, 1, 1], [], []>} : vector<8x18xf32>, vector<18x128xf32>, vector<8x128xf32> -> vector<8x128xf32>
    %c0_3 = arith.constant 0 : index
    %c0_4 = arith.constant 0 : index
    %3 = vector.load %arg2[%c0_3, %c0_4] : memref<8x10xf32, #tpu.memory_space<vmem>>, vector<8x10xf32>
    %c0_5 = arith.constant 0 : index
    %c0_6 = arith.constant 0 : index
    %4 = vector.load %arg4[%c0_5, %c0_6] : memref<10x128xf32, #tpu.memory_space<vmem>>, vector<10x128xf32>
    %cst_7 = arith.constant dense<0.000000e+00> : vector<8x128xf32>
    %5 = tpu.matmul %3, %4, %cst_7 {dimension_numbers = #tpu.dot_dimension_numbers<[1], [0], [0], [1], [0, 0, 1, 1], [], []>} : vector<8x10xf32>, vector<10x128xf32>, vector<8x128xf32> -> vector<8x128xf32>
    %6 = arith.addf %2, %5 : vector<8x128xf32>
    %c0_8 = arith.constant 0 : index
    %c0_9 = arith.constant 0 : index
    %7 = vector.load %arg5[%c0_8, %c0_9] : memref<1x128xf32, #tpu.memory_space<vmem>>, vector<1x128xf32>
    %8 = vector.broadcast %7 : vector<1x128xf32> to vector<8x128xf32>
    %9 = arith.addf %6, %8 : vector<8x128xf32>
    %cst_10 = arith.constant 0.000000e+00 : f32
    %10 = vector.broadcast %cst_10 : f32 to vector<8x128xf32>
    %11 = arith.maximumf %9, %10 : vector<8x128xf32>
    %c0_11 = arith.constant 0 : index
    %c0_12 = arith.constant 0 : index
    %12 = vector.load %arg6[%c0_11, %c0_12] : memref<128x128xf32, #tpu.memory_space<vmem>>, vector<128x128xf32>
    %cst_13 = arith.constant dense<0.000000e+00> : vector<8x128xf32>
    %13 = tpu.matmul %11, %12, %cst_13 {dimension_numbers = #tpu.dot_dimension_numbers<[1], [0], [0], [1], [0, 0, 1, 1], [], []>} : vector<8x128xf32>, vector<128x128xf32>, vector<8x128xf32> -> vector<8x128xf32>
    %c0_14 = arith.constant 0 : index
    %c0_15 = arith.constant 0 : index
    %14 = vector.load %arg7[%c0_14, %c0_15] : memref<1x128xf32, #tpu.memory_space<vmem>>, vector<1x128xf32>
    %15 = vector.broadcast %14 : vector<1x128xf32> to vector<8x128xf32>
    %16 = arith.addf %13, %15 : vector<8x128xf32>
    %cst_16 = arith.constant 0.000000e+00 : f32
    %17 = vector.broadcast %cst_16 : f32 to vector<8x128xf32>
    %18 = arith.maximumf %16, %17 : vector<8x128xf32>
    %c0_17 = arith.constant 0 : index
    %c0_18 = arith.constant 0 : index
    %19 = vector.load %arg8[%c0_17, %c0_18] : memref<128x128xf32, #tpu.memory_space<vmem>>, vector<128x128xf32>
    %cst_19 = arith.constant dense<0.000000e+00> : vector<8x128xf32>
    %20 = tpu.matmul %18, %19, %cst_19 {dimension_numbers = #tpu.dot_dimension_numbers<[1], [0], [0], [1], [0, 0, 1, 1], [], []>} : vector<8x128xf32>, vector<128x128xf32>, vector<8x128xf32> -> vector<8x128xf32>
    %c0_20 = arith.constant 0 : index
    %c0_21 = arith.constant 0 : index
    %21 = vector.load %arg9[%c0_20, %c0_21] : memref<1x128xf32, #tpu.memory_space<vmem>>, vector<1x128xf32>
    %22 = vector.broadcast %21 : vector<1x128xf32> to vector<8x128xf32>
    %23 = arith.addf %20, %22 : vector<8x128xf32>
    %c0_22 = arith.constant 0 : index
    %c0_23 = arith.constant 0 : index
    %24 = vector.load %arg10[%c0_22, %c0_23] : memref<8x128xf32, #tpu.memory_space<vmem>>, vector<8x128xf32>
    tpu.vector_store %arg10[%c0_22, %c0_23], %23 {strides = array<i32>} : memref<8x128xf32, #tpu.memory_space<vmem>>, vector<8x128xf32>,
    return
  }
  func.func @transform_0(%arg0: i32) -> (i32, i32) {
    %c0_i32 = arith.constant 0 : i32
    %c0_i32_0 = arith.constant 0 : i32
    return %arg0, %c0_i32 : i32, i32
  }
  func.func @transform_1(%arg0: i32) -> (i32, i32) {
    %c0_i32 = arith.constant 0 : i32
    %c0_i32_0 = arith.constant 0 : i32
    return %arg0, %c0_i32 : i32, i32
  }
  func.func @transform_2(%arg0: i32) -> (i32, i32) {
    %c0_i32 = arith.constant 0 : i32
    %c0_i32_0 = arith.constant 0 : i32
    %c0_i32_1 = arith.constant 0 : i32
    return %c0_i32, %c0_i32_0 : i32, i32
  }
  func.func @transform_3(%arg0: i32) -> (i32, i32) {
    %c0_i32 = arith.constant 0 : i32
    %c0_i32_0 = arith.constant 0 : i32
    %c0_i32_1 = arith.constant 0 : i32
    return %c0_i32, %c0_i32_0 : i32, i32
  }
  func.func @transform_4(%arg0: i32) -> (i32, i32) {
    %c0_i32 = arith.constant 0 : i32
    %c0_i32_0 = arith.constant 0 : i32
    %c0_i32_1 = arith.constant 0 : i32
    return %c0_i32, %c0_i32_0 : i32, i32
  }
  func.func @transform_5(%arg0: i32) -> (i32, i32) {
    %c0_i32 = arith.constant 0 : i32
    %c0_i32_0 = arith.constant 0 : i32
    %c0_i32_1 = arith.constant 0 : i32
    return %c0_i32, %c0_i32_0 : i32, i32
  }
  func.func @transform_6(%arg0: i32) -> (i32, i32) {
    %c0_i32 = arith.constant 0 : i32
    %c0_i32_0 = arith.constant 0 : i32
    %c0_i32_1 = arith.constant 0 : i32
    return %c0_i32, %c0_i32_0 : i32, i32
  }
  func.func @transform_7(%arg0: i32) -> (i32, i32) {
    %c0_i32 = arith.constant 0 : i32
    %c0_i32_0 = arith.constant 0 : i32
    %c0_i32_1 = arith.constant 0 : i32
    return %c0_i32, %c0_i32_0 : i32, i32
  }
  func.func @transform_8(%arg0: i32) -> (i32, i32) {
    %c0_i32 = arith.constant 0 : i32
    %c0_i32_0 = arith.constant 0 : i32
    %c0_i32_1 = arith.constant 0 : i32
    return %c0_i32, %c0_i32_0 : i32, i32
  }
  func.func @transform_9(%arg0: i32) -> (i32, i32) {
    %c0_i32 = arith.constant 0 : i32
    %c0_i32_0 = arith.constant 0 : i32
    return %arg0, %c0_i32 : i32, i32
  }
}

</mosaic_0001>

<bundles_post_ra>
// kernel: _lambda_.1
= control target key start
LH: loop header
LB: loop body
LE: loop exit
PB: predicated region body
PF: predicated region fallthrough
CT: control target
= control target key end

     0   :  { %14 = vsyncpa [#allocation3], 0  ;;  %s809_s0 = inlined_call_operand.vmem [shape: f32[8,18], index: 0, kind: input, shape index: {}]   ;;  %s810_s1 = inlined_call_operand.vmem [shape: f32[8,10], index: 1, kind: input, shape index: {}]   ;;  %s811_s2 = inlined_call_operand.vmem [shape: f32[18,128], index: 2, kind: input, shape index: {}]   ;;  %s812_s3 = inlined_call_operand.vmem [shape: f32[10,128], index: 3, kind: input, shape index: {}]   ;;  %s813_s4 = inlined_call_operand.vmem [shape: f32[1,128], index: 4, kind: input, shape index: {}]   ;;  %s814_s5 = inlined_call_operand.hbm [shape: f32[128,128], index: 5, kind: input, shape index: {}]   ;;  %s815_s6 = inlined_call_operand.vmem [shape: f32[1,128], index: 6, kind: input, shape index: {}]   ;;  %s816_s7 = inlined_call_operand.hbm [shape: f32[128,128], index: 7, kind: input, shape index: {}]   ;;  %s817_s8 = inlined_call_operand.vmem [shape: f32[1,128], index: 8, kind: input, shape index: {}]   ;;  %s818_s9 = inlined_call_operand.vmem [shape: f32[8,128], index: 9, kind: output, shape index: {}]  }
   0x1   :  { %15 = vsyncpa [#allocation5], 0  ;;  %s670_s30 = smov [#allocation2]   ;;  %s622_s13 = scalar_lea.hbm %s814_s5, 2048 }
   0x2   :  { %s31_s10 = sshll.u32 %s670_s30, 4  ;;  %p623_p0 = scmp.ne.s32.totalorder %s814_s5, %s622_s13  ;;  %s32_s10 = int_to_ptr.vmem [resolvable:$true] %s31_s10 }
   0x3   :  { %p626_p1 = scmp.lt.u32.totalorder %s622_s13, %s814_s5 }
   0x5   :  { %p628_p2 = pnand %p626_p1, %p623_p0 }
   0x7   :  { %631 = shalt.err (!%p628_p2)
}
   0x8   :  { %s632_s18 = scalar_lea.vmem %s32_s10, 2048  ;;  %p637_p4 = scmp.lt.s32.totalorder %s32_s10, %s32_s10 }
   0x9   :  { %p633_p3 = scmp.ne.s32.totalorder %s32_s10, %s632_s18  ;;  %p638_p5 = scmp.lt.s32.totalorder %s632_s18, %s632_s18 }
   0xb   :  { %p639_p6 = por %p638_p5, %p637_p4 }
   0xd   :  { %p640_p7 = pnand %p639_p6, %p633_p3 }
   0xf   :  { %643 = shalt.err (!%p640_p7)
}
  0x10   :  { %s671_s19 = smov 128   ;;  %s672_s20 = smov 8  }
  0x11   :  { %37 = dma.hbm_to_vmem [thread:$0]  %s814_s5, 2048, %s32_s10, [#allocation3], %s671_s19, %s671_s19, %s672_s20  }
  0x12   :  { %s673_s23 = smov [#allocation4]   ;;  %s644_s27 = scalar_lea.hbm %s816_s7, 2048 }
  0x13   :  { %s45_s24 = sshll.u32 %s673_s23, 4  ;;  %p645_p8 = scmp.ne.s32.totalorder %s816_s7, %s644_s27  ;;  %s46_s24 = int_to_ptr.vmem [resolvable:$true] %s45_s24 }
  0x14   :  { %p648_p9 = scmp.lt.u32.totalorder %s644_s27, %s816_s7 }
  0x16   :  { %p650_p10 = pnand %p648_p9, %p645_p8 }
  0x18   :  { %653 = shalt.err (!%p650_p10)
}
  0x19   :  { %s654_s12 = scalar_lea.vmem %s46_s24, 2048  ;;  %p659_p12 = scmp.lt.s32.totalorder %s46_s24, %s46_s24 }
  0x1a   :  { %p655_p11 = scmp.ne.s32.totalorder %s46_s24, %s654_s12  ;;  %p660_p13 = scmp.lt.s32.totalorder %s654_s12, %s654_s12 }
  0x1c   :  { %p661_p0 = por %p660_p13, %p659_p12 }
  0x1e   :  { %p662_p1 = pnand %p661_p0, %p655_p11 }
  0x20   :  { %665 = shalt.err (!%p662_p1)
}
  0x21   :  { %51 = dma.hbm_to_vmem [thread:$0]  %s816_s7, 2048, %s46_s24, [#allocation5], %s671_s19, %s671_s19, %s672_s20  }
  0x22   :  { %666 = dma.done.wait [#allocation3], 2048  }
  0x23   :  { %667 = vsyncadd [#allocation3], 4294965248 }
  0x24   :  { %668 = dma.done.wait [#allocation5], 2048  }
  0x25   :  { %669 = vsyncadd [#allocation5], 4294965248  ;;  %v674_v0 = vmov 0.0|0.0   ;;  %vm675_vm0 = vmmov 0   ;;  %v676_v1 = vmov 0.0   ;;  %vm71_vm1 = vcmask 1041408  }
  0x26   :  { %563 = vmatprep.subr.bf16.mxu1 %v674_v0  ;;  %559 = vmatprep.subr.bf16.mxu0 %v674_v0  ;;  %v61_v2 = vld [vmem:[%s811_s2] sm:$0xff]  ;;  %v62_v3 = vld [vmem:[%s811_s2 + $0x8] sm:$0xff]  ;;  %vm677_vm2 = vmmov 1   ;;  %vm67_vm4 = vcmask 80896   ;;  %v63_v11 = vld [vmem:[%s811_s2 + $0x10] sm:$0x3] }
  0x27   :  { %477 = vmatprep.mubr.msk.f32.mxu0 %vm675_vm0, %v676_v1  ;;  %486 = vmatprep.mubr.msk.f32.mxu1 %vm675_vm0, %v676_v1  ;;  %v65_v4 = vld [vmem:[%s812_s3] sm:$0xff]  ;;  %v564_v5 = vpack.c.bf16 %v62_v3, %v61_v2  ;;  %v66_v6 = vld [vmem:[%s812_s3 + $0x8] sm:$0x3]  ;;  %vm561_vm3 = vmpackc.low %vm71_vm1, %vm677_vm2  ;;  %vm145_vm5 = vcmask 146432  }
  0x28   :  { %v560_v7 = vpack.c.bf16 %v66_v6, %v65_v4  ;;  %v231_v8 = vld [vmem:[#allocation2] sm:$0xff]  ;;  %v232_v9 = vld [vmem:[#allocation2 + $0x8] sm:$0xff]  ;;  %v233_v14 = vld [vmem:[#allocation2 + $0x10] sm:$0xff] }
  0x29   :  { %565 = vmatpush3.bf16.msra.mxu1 %v564_v5  ;;  %v64_v10 = vld [vmem:[%s810_s1] sm:$0xff]  ;;  %v567_v12 = vpack.c.bf16 %v232_v9, %v231_v8  ;;  %v234_v15 = vld [vmem:[#allocation2 + $0x18] sm:$0xff]  ;;  %v236_v18 = vld [vmem:[#allocation2 + $0x28] sm:$0xff] }
  0x2a   :  { %562 = vmatpush3.bf16.msk.msra.mxu0 %vm561_vm3, %v560_v7  ;;  %484 = vmatprep.subr.mxu1 %v676_v1  ;;  %v60_v13 = vld [vmem:[%s809_s0] sm:$0xff]  ;;  %v570_v16 = vpack.c.bf16 %v234_v15, %v233_v14  ;;  %v237_v20 = vld [vmem:[#allocation2 + $0x30] sm:$0xff]  ;;  %v238_v21 = vld [vmem:[#allocation2 + $0x38] sm:$0xff] }
  0x2b   :  { %566 = vmatprep.subr.bf16.mxu0 %v674_v0  ;;  %v235_v17 = vld [vmem:[#allocation2 + $0x20] sm:$0xff]  ;;  %v576_v22 = vpack.c.bf16 %v238_v21, %v237_v20  ;;  %v240_v24 = vld [vmem:[#allocation2 + $0x48] sm:$0xff]  ;;  %v241_v26 = vld [vmem:[#allocation2 + $0x50] sm:$0xff] }
  0x2c   :  { %v573_v19 = vpack.c.bf16 %v236_v18, %v235_v17  ;;  %v239_v23 = vld [vmem:[#allocation2 + $0x40] sm:$0xff]  ;;  %v242_v27 = vld [vmem:[#allocation2 + $0x58] sm:$0xff]  ;;  %v244_v30 = vld [vmem:[#allocation2 + $0x68] sm:$0xff] }
  0x2d   :  { %478 = vmatmul.mubr.msk.f32.vlgmr.msra.gmra.mrb[0].mxu0 %vm67_vm4, %v64_v10  ;;  %485 = vmatpush3.msk.msra.mxu1 %vm71_vm1, %v63_v11  ;;  %v579_v25 = vpack.c.bf16 %v240_v24, %v239_v23  ;;  %v582_v28 = vpack.c.bf16 %v242_v27, %v241_v26  ;;  %v243_v29 = vld [vmem:[#allocation2 + $0x60] sm:$0xff]  ;;  %v245_v32 = vld [vmem:[#allocation2 + $0x70] sm:$0xff]  ;;  %v246_v33 = vld [vmem:[#allocation2 + $0x78] sm:$0xff] }
  0x2e   :  { %487 = vmatmul.mubr.msk.f32.vlgmr.msra.gmra.mrb[0].mxu1 %vm145_vm5, %v60_v13  ;;  %568 = vmatpush3.bf16.msra.mxu0 %v567_v12  ;;  %v585_v31 = vpack.c.bf16 %v244_v30, %v243_v29  ;;  %v588_v34 = vpack.c.bf16 %v246_v33, %v245_v32  ;;  %v325_v35 = vld [vmem:[#allocation4] sm:$0xff]  ;;  %v326_v36 = vld [vmem:[#allocation4 + $0x8] sm:$0xff]  ;;  %v327_v37 = vld [vmem:[#allocation4 + $0x10] sm:$0xff] }
  0x2f   :  { %569 = vmatprep.subr.bf16.mxu0 %v674_v0  ;;  %521 = vmatprep.mubr.msk.f32.mxu0 %vm675_vm0, %v676_v1  ;;  %v591_v38 = vpack.c.bf16 %v326_v36, %v325_v35  ;;  %v328_v39 = vld [vmem:[#allocation4 + $0x18] sm:$0xff]  ;;  %v329_v41 = vld [vmem:[#allocation4 + $0x20] sm:$0xff]  ;;  %v330_v42 = vld [vmem:[#allocation4 + $0x28] sm:$0xff] }
  0x30   :  { %590 = vmatprep.subr.bf16.mxu1 %v674_v0  ;;  %556 = vmatprep.mubr.msk.f32.mxu1 %vm675_vm0, %v676_v1  ;;  %v594_v40 = vpack.c.bf16 %v328_v39, %v327_v37  ;;  %v597_v43 = vpack.c.bf16 %v330_v42, %v329_v41  ;;  %v331_v44 = vld [vmem:[#allocation4 + $0x30] sm:$0xff]  ;;  %v332_v45 = vld [vmem:[#allocation4 + $0x38] sm:$0xff]  ;;  %v333_v47 = vld [vmem:[#allocation4 + $0x40] sm:$0xff] }
  0x31   :  { %592 = vmatpush3.bf16.msra.mxu1 %v591_v38  ;;  %v600_v46 = vpack.c.bf16 %v332_v45, %v331_v44  ;;  %v334_v48 = vld [vmem:[#allocation4 + $0x48] sm:$0xff]  ;;  %v335_v50 = vld [vmem:[#allocation4 + $0x50] sm:$0xff]  ;;  %v336_v51 = vld [vmem:[#allocation4 + $0x58] sm:$0xff] }
  0x32   :  { %571 = vmatpush3.bf16.msra.mxu0 %v570_v16  ;;  %593 = vmatprep.subr.bf16.mxu1 %v674_v0  ;;  %v603_v49 = vpack.c.bf16 %v334_v48, %v333_v47  ;;  %v606_v52 = vpack.c.bf16 %v336_v51, %v335_v50  ;;  %v337_v53 = vld [vmem:[#allocation4 + $0x60] sm:$0xff]  ;;  %v338_v54 = vld [vmem:[#allocation4 + $0x68] sm:$0xff]  ;;  %v339_v1 = vld [vmem:[#allocation4 + $0x70] sm:$0xff] }
  0x33   :  { %572 = vmatprep.subr.bf16.mxu0 %v674_v0  ;;  %v609_v55 = vpack.c.bf16 %v338_v54, %v337_v53  ;;  %v429_v59 = vld [vmem:[%s813_s4] ss:$0 sm:$0xff]  ;;  %v340_v2 = vld [vmem:[#allocation4 + $0x78] sm:$0xff] }
  0x34   :  { %v612_v3 = vpack.c.bf16 %v340_v2, %v339_v1  ;;  %v431_v8 = vld [vmem:[%s817_s8] ss:$0 sm:$0xff] }
  0x35   :  { %595 = vmatpush3.bf16.msra.mxu1 %v594_v40 }
  0x36   :  { %574 = vmatpush3.bf16.msra.mxu0 %v573_v19  ;;  %596 = vmatprep.subr.bf16.mxu1 %v674_v0 }
  0x37   :  { %575 = vmatprep.subr.bf16.mxu0 %v674_v0 }
  0x39   :  { %598 = vmatpush3.bf16.msra.mxu1 %v597_v43 }
  0x3a   :  { %577 = vmatpush3.bf16.msra.mxu0 %v576_v22  ;;  %599 = vmatprep.subr.bf16.mxu1 %v674_v0 }
  0x3b   :  { %578 = vmatprep.subr.bf16.mxu0 %v674_v0 }
  0x3d   :  { %601 = vmatpush3.bf16.msra.mxu1 %v600_v46 }
  0x3e   :  { %580 = vmatpush3.bf16.msra.mxu0 %v579_v25  ;;  %602 = vmatprep.subr.bf16.mxu1 %v674_v0 }
  0x3f   :  { %581 = vmatprep.subr.bf16.mxu0 %v674_v0 }
  0x41   :  { %604 = vmatpush3.bf16.msra.mxu1 %v603_v49 }
  0x42   :  { %583 = vmatpush3.bf16.msra.mxu0 %v582_v28  ;;  %605 = vmatprep.subr.bf16.mxu1 %v674_v0 }
  0x43   :  { %584 = vmatprep.subr.bf16.mxu0 %v674_v0 }
  0x45   :  { %607 = vmatpush3.bf16.msra.mxu1 %v606_v52 }
  0x46   :  { %586 = vmatpush3.bf16.msra.mxu0 %v585_v31  ;;  %608 = vmatprep.subr.bf16.mxu1 %v674_v0 }
  0x47   :  { %587 = vmatprep.subr.bf16.mxu0 %v674_v0 }
  0x49   :  { %610 = vmatpush3.bf16.msra.mxu1 %v609_v55 }
  0x4a   :  { %589 = vmatpush3.bf16.msra.mxu0 %v588_v34  ;;  %611 = vmatprep.subr.bf16.mxu1 %v674_v0  ;;  %v430_v0 = vld [vmem:[%s815_s6] ss:$0 sm:$0xff] }
  0x4d   :  { %613 = vmatpush3.bf16.msra.mxu1 %v612_v3 }
 0x100   :  { %v141_v56 = vpop.f32.mrb[0].mxu0 }
 0x101   :  { %v479_v57 = vpop.f32.mrb[1].mxu0  ;;  %v218_v58 = vpop.f32.mrb[0].mxu1 }
 0x102   :  { %v219_v60 = vadd.f32 %v218_v58, %v141_v56  ;;  %v488_v61 = vpop.f32.mrb[1].mxu1 }
 0x104   :  { %v229_v62 = vadd.f32 %v429_v59, %v219_v60 }
 0x106   :  { %v230_v63 = vmax.f32 %v229_v62, 0.0 }
 0x108   :  { %522 = vmatmul.mubr.f32.vlgmr.msra.gmra.mrb[2].mxu0 %v230_v63 }
 0x1db   :  { %v320_v4 = vpop.f32.mrb[2].mxu0 }
 0x1dc   :  { %v321_v5 = vadd.f32 %v430_v0, %v320_v4  ;;  %v523_v6 = vpop.f32.mrb[3].mxu0 }
 0x1de   :  { %v324_v7 = vmax.f32 %v321_v5, 0.0 }
 0x1e0   :  { %557 = vmatmul.mubr.f32.vlgmr.msra.gmra.mrb[2].mxu1 %v324_v7 }
 0x2b3   :  { %v414_v9 = vpop.f32.mrb[2].mxu1 }
 0x2b4   :  { %v415_v10 = vadd.f32 %v431_v8, %v414_v9  ;;  %v558_v11 = vpop.f32.mrb[3].mxu1 }
 0x2b6   :  { %418 = vst [vmem:[%s818_s9] sm:$0xff] %v415_v10 }
 0x2b7   :  { %423 = vsyncpa [#allocation3], 1 }
 0x2b8   :  { %424 = vsyncpa [#allocation5], 1 }

</bundles_post_ra>
